<compile_context>
chip_gen: v5e
topology: v5e:2x2
jax: 0.10.0
libtpu: 0.0.40
codegen_flags: <defaults>
</compile_context>

<pallas_src>
import functools

import jax
import jax.numpy as jnp
from jax.experimental import pallas as pl
from jax.experimental.pallas import tpu as pltpu

H1 = 400
H2 = 300

_LANE = 128


def _round_up(x, m):
    return (x + m - 1) // m * m


H1_PAD = _round_up(H1, _LANE)  # 512
H2_PAD = _round_up(H2, _LANE)  # 384


def _bc_actor_kernel(x_ref, w1_ref, b1_ref, w2_ref, b2_ref, w3_ref, b3_ref, o_ref):
    # x and the weights share the MXU compute dtype (f32 or bf16); biases and all
    # element-wise math (ReLU / Tanh / accumulators) stay f32.
    compute_dtype = w1_ref.dtype
    x = x_ref[...]

    # Layer 1: Linear(d_in, 512) + ReLU   (MXU matmul, f32 accumulate)
    h1 = jnp.dot(x, w1_ref[...], preferred_element_type=jnp.float32) + b1_ref[...]
    h1 = jnp.maximum(h1, 0.0)

    # Layer 2: Linear(512, 384) + ReLU
    h2 = (
        jnp.dot(h1.astype(compute_dtype), w2_ref[...], preferred_element_type=jnp.float32)
        + b2_ref[...]
    )
    h2 = jnp.maximum(h2, 0.0)

    # Layer 3: Linear(384, d_out_pad) + Tanh   (EUP tanh, lane-dense store)
    y = (
        jnp.dot(h2.astype(compute_dtype), w3_ref[...], preferred_element_type=jnp.float32)
        + b3_ref[...]
    )
    o_ref[...] = jnp.tanh(y).astype(o_ref.dtype)


def init_params(key, input_dim, output_dim):
    """Deterministic init matching the PyTorch module's parameter shapes.

    PyTorch stores Linear weights as [out, in]; we store the transpose
    [in, out] so the kernel does x @ W directly.  Shapes are UNPADDED here
    (exact module semantics); call prepare_params() before bc_actor_forward().
    """
    ks = jax.random.split(key, 6)

    def uniform(k, shape, fan_in):
        bound = 1.0 / jnp.sqrt(fan_in)
        return jax.random.uniform(k, shape, jnp.float32, -bound, bound)

    w1 = uniform(ks[0], (input_dim, H1), input_dim)
    b1 = uniform(ks[1], (1, H1), input_dim)
    w2 = uniform(ks[2], (H1, H2), H1)
    b2 = uniform(ks[3], (1, H2), H1)
    w3 = uniform(ks[4], (H2, output_dim), H2)
    b3 = uniform(ks[5], (1, output_dim), H2)
    return (w1, b1, w2, b2, w3, b3)


def prepare_params(params, weight_dtype=jnp.float32):
    """Zero-pad hidden/output feature dims to lane-friendly sizes and cast weights.

    The input dim is NOT padded (x is streamed at its true width).  Zero padding of
    hidden/output columns is numerically exact through Linear/ReLU/Tanh; the wrapper
    slices the true output columns back out.

    weight_dtype=jnp.bfloat16 is recommended on every TPU generation (v5e/v6e/v7x MXUs
    are natively bf16; f32 matmul is a slower multi-pass).  Biases stay f32 and all
    element-wise math in the kernel is f32, so only the matmul inputs are rounded.
    """
    w1, b1, w2, b2, w3, b3 = params
    d_out = w3.shape[1]
    d_out_p = _round_up(d_out, _LANE)

    def pad_cols(a, cols):
        return jnp.pad(a, ((0, 0), (0, cols - a.shape[1])))

    def pad2(a, rows, cols):
        return jnp.pad(a, ((0, rows - a.shape[0]), (0, cols - a.shape[1])))

    return (
        pad_cols(w1, H1_PAD).astype(weight_dtype),            # (d_in, 512)
        pad_cols(b1, H1_PAD).astype(jnp.float32),              # (1, 512)
        pad2(w2, H1_PAD, H2_PAD).astype(weight_dtype),         # (512, 384)
        pad_cols(b2, H2_PAD).astype(jnp.float32),              # (1, 384)
        pad2(w3, H2_PAD, d_out_p).astype(weight_dtype),        # (384, d_out_pad)
        pad_cols(b3, d_out_p).astype(jnp.float32),             # (1, d_out_pad)
    )


def bc_actor_forward(
    x,
    padded_params,
    output_dim,
    *,
    batch_tile=1024,
    min_split_batch=512,
    out_dtype=jnp.float32,
    return_padded=False,
):
    """x: [B, input_dim] -> [B, output_dim] (or the padded [B_pad, d_out_pad] slab).

    return_padded=True skips the wrapper-side slice pass (downstream consumes the
    lane-dense slab directly); out_dtype=jnp.bfloat16 halves the output writeback.
    """
    w1, b1, w2, b2, w3, b3 = padded_params
    B, d_in = x.shape
    assert w1.shape[0] == d_in, "input_dim mismatch between x and prepared params"
    d_out_pad = w3.shape[1]
    in_dtype = w1.dtype  # x is cast to the weight/compute dtype (bf16 halves the stream)

    # --- Batch tiling -------------------------------------------------------
    # Small B: one grid step (avoid per-step pipeline overhead).
    # Large B: >=2 (even) steps so v7x's two TensorCores split the "parallel" axis,
    # and the tile is evened out so padding waste is < 8 rows per step.
    if B < min_split_batch and B <= batch_tile:
        n_steps = 1
        tile = max(8, _round_up(B, 8))
    else:
        n_steps = max(2, pl.cdiv(B, batch_tile))
        if n_steps % 2:
            n_steps += 1
        tile = max(8, _round_up(pl.cdiv(B, n_steps), 8))
    B_pad = n_steps * tile

    # Pad batch rows only (exact: extra rows are sliced off below).
    x_pad = jnp.pad(x.astype(in_dtype), ((0, B_pad - B), (0, 0)))

    grid = (n_steps,)

    def resident(shape):
        # Grid-invariant operand: constant index map keeps it VMEM-resident; a single
        # buffer (Buffered(1)) drops the dead second buffer and its prologue DMA.
        return pl.BlockSpec(shape, lambda i: (0, 0), pipeline_mode=pl.Buffered(buffer_count=1))

    in_itm = jnp.dtype(in_dtype).itemsize
    out_itm = jnp.dtype(out_dtype).itemsize
    weight_bytes = sum(a.size * a.dtype.itemsize for a in padded_params)

    flops = 2 * B_pad * (d_in * H1_PAD + H1_PAD * H2_PAD + H2_PAD * d_out_pad)
    bytes_accessed = (
        x_pad.size * in_itm + weight_bytes + B_pad * d_out_pad * out_itm
    )

    # Per-step VMEM estimate: double-buffered x/out tiles, single-buffered weights,
    # f32 intermediates (h1/h2) plus their compute-dtype copies.
    vmem_est = (
        2 * tile * d_in * in_itm
        + 2 * tile * d_out_pad * out_itm
        + weight_bytes
        + tile * (H1_PAD + H2_PAD) * (4 + in_itm)
    )
    compiler_kwargs = {}
    if vmem_est + vmem_est // 2 > 32 * 1024 * 1024:
        # Only very large tiles (>~4K rows) need an explicit budget; cap well under
        # v7x's 64 MiB physical VMEM.
        compiler_kwargs["vmem_limit_bytes"] = min(vmem_est + vmem_est // 2, 56 * 1024 * 1024)

    out = pl.pallas_call(
        _bc_actor_kernel,
        out_shape=jax.ShapeDtypeStruct((B_pad, d_out_pad), out_dtype),
        grid_spec=pl.GridSpec(
            grid=grid,
            in_specs=[
                pl.BlockSpec((tile, d_in), lambda i: (i, 0)),  # x tile (true width)
                resident((d_in, H1_PAD)),   # W1
                resident((1, H1_PAD)),      # b1
                resident((H1_PAD, H2_PAD)),  # W2
                resident((1, H2_PAD)),      # b2
                resident((H2_PAD, d_out_pad)),  # W3
                resident((1, d_out_pad)),   # b3
            ],
            out_specs=pl.BlockSpec((tile, d_out_pad), lambda i: (i, 0)),
        ),
        compiler_params=pltpu.CompilerParams(
            dimension_semantics=("parallel",),
            **compiler_kwargs,
        ),
        cost_estimate=pl.CostEstimate(
            flops=flops,
            transcendentals=B_pad * d_out_pad,
            bytes_accessed=bytes_accessed,
        ),
    )(x_pad, w1, b1, w2, b2, w3, b3)

    if return_padded:
        return out  # lane-dense (B_pad, d_out_pad) slab; cols >= output_dim are zero-ish padding
    return out[:B, :output_dim]


def reference_forward(x, params):
    """Pure-JAX reference with the exact PyTorch semantics (unpadded f32)."""
    w1, b1, w2, b2, w3, b3 = params
    h1 = jnp.maximum(x @ w1 + b1, 0.0)
    h2 = jnp.maximum(h1 @ w2 + b2, 0.0)
    return jnp.tanh(h2 @ w3 + b3)


def reference_forward_bf16(x, params):
    """Reference emulating bf16 weight/activation storage with f32 accumulation."""
    w1, b1, w2, b2, w3, b3 = params
    f = lambda a: a.astype(jnp.bfloat16).astype(jnp.float32)
    h1 = jnp.maximum(f(x) @ f(w1) + b1, 0.0)
    h2 = jnp.maximum(f(h1) @ f(w2) + b2, 0.0)
    return jnp.tanh(f(h2) @ f(w3) + b3)


if __name__ == "__main__":
    key = jax.random.PRNGKey(0)
    k_x, k_p, k_big = jax.random.split(key, 3)

    batch = 2
    input_dim = 32   # small state-vector dimension
    output_dim = 8   # small action dimension

    x = jax.random.normal(k_x, (batch, input_dim), jnp.float32)
    params = init_params(k_p, input_dim, output_dim)

    # f32 path: exact module semantics (single-step grid).
    pparams_f32 = prepare_params(params, jnp.float32)
    y = jax.block_until_ready(bc_actor_forward(x, pparams_f32, output_dim))
    y_ref = reference_forward(x, params)
    assert y.shape == (batch, output_dim)
    assert jnp.allclose(y, y_ref, atol=1e-5, rtol=1e-5), "f32 mismatch vs reference"

    # bf16 weight/activation storage path (recommended on all generations): compare
    # against a bf16-rounded reference; residual diff is only MXU accumulation order.
    pparams_bf16 = prepare_params(params, jnp.bfloat16)
    y_bf16 = jax.block_until_ready(bc_actor_forward(x, pparams_bf16, output_dim))
    y_ref_bf16 = reference_forward_bf16(x, params)
    assert y_bf16.shape == (batch, output_dim)
    assert jnp.allclose(y_bf16, y_ref_bf16, atol=2e-2, rtol=2e-2), "bf16 mismatch vs reference"

    # Medium batch: exercises the even multi-step grid (megacore split) and the
    # single-buffered VMEM-resident weights across steps.
    big_B = 600
    x_big = jax.random.normal(k_big, (big_B, input_dim), jnp.float32)
    y_big = jax.block_until_ready(bc_actor_forward(x_big, pparams_f32, output_dim))
    y_big_ref = reference_forward(x_big, params)
    assert y_big.shape == (big_B, output_dim)
    assert jnp.allclose(y_big, y_big_ref, atol=1e-5, rtol=1e-5), "multi-step mismatch vs reference"

    print("KERNEL_OK")
</pallas_src>

<mosaic_0001>
module attributes {stable_mosaic.version = 11 : i64} {
  func.func @_bc_actor_kernel(%arg0: i32, %arg1: memref<8x32xf32, #tpu.memory_space<vmem>>, %arg2: memref<32x512xf32, #tpu.memory_space<vmem>>, %arg3: memref<1x512xf32, #tpu.memory_space<vmem>>, %arg4: memref<512x384xf32, #tpu.memory_space<vmem>>, %arg5: memref<1x384xf32, #tpu.memory_space<vmem>>, %arg6: memref<384x128xf32, #tpu.memory_space<vmem>>, %arg7: memref<1x128xf32, #tpu.memory_space<vmem>>, %arg8: memref<8x128xf32, #tpu.memory_space<vmem>>) attributes {dimension_semantics = [#tpu.dimension_semantics<parallel>], iteration_bounds = array<i64: 1>, scalar_prefetch = 0 : i64, scratch_operands = 0 : i64, tpu.core_type = #tpu.core_type<tc>, window_params = [{transform_indices = @transform_0, window_bounds = array<i64: 8, 32>}, {pipeline_mode = #tpu.pipeline_mode<synchronous>, transform_indices = @transform_1, window_bounds = array<i64: 32, 512>}, {pipeline_mode = #tpu.pipeline_mode<synchronous>, transform_indices = @transform_2, window_bounds = array<i64: 1, 512>}, {pipeline_mode = #tpu.pipeline_mode<synchronous>, transform_indices = @transform_3, window_bounds = array<i64: 512, 384>}, {pipeline_mode = #tpu.pipeline_mode<synchronous>, transform_indices = @transform_4, window_bounds = array<i64: 1, 384>}, {pipeline_mode = #tpu.pipeline_mode<synchronous>, transform_indices = @transform_5, window_bounds = array<i64: 384, 128>}, {pipeline_mode = #tpu.pipeline_mode<synchronous>, transform_indices = @transform_6, window_bounds = array<i64: 1, 128>}, {transform_indices = @transform_7, window_bounds = array<i64: 8, 128>}]} {
    %c0 = arith.constant 0 : index
    %c0_0 = arith.constant 0 : index
    %0 = vector.load %arg1[%c0, %c0_0] : memref<8x32xf32, #tpu.memory_space<vmem>>, vector<8x32xf32>
    %c0_1 = arith.constant 0 : index
    %c0_2 = arith.constant 0 : index
    %1 = vector.load %arg2[%c0_1, %c0_2] : memref<32x512xf32, #tpu.memory_space<vmem>>, vector<32x512xf32>
    %cst = arith.constant dense<0.000000e+00> : vector<8x512xf32>
    %2 = tpu.matmul %0, %1, %cst {dimension_numbers = #tpu.dot_dimension_numbers<[1], [0], [0], [1], [0, 0, 1, 1], [], []>} : vector<8x32xf32>, vector<32x512xf32>, vector<8x512xf32> -> vector<8x512xf32>
    %c0_3 = arith.constant 0 : index
    %c0_4 = arith.constant 0 : index
    %3 = vector.load %arg3[%c0_3, %c0_4] : memref<1x512xf32, #tpu.memory_space<vmem>>, vector<1x512xf32>
    %4 = vector.broadcast %3 : vector<1x512xf32> to vector<8x512xf32>
    %5 = arith.addf %2, %4 : vector<8x512xf32>
    %cst_5 = arith.constant 0.000000e+00 : f32
    %6 = vector.broadcast %cst_5 : f32 to vector<8x512xf32>
    %7 = arith.maximumf %5, %6 : vector<8x512xf32>
    %c0_6 = arith.constant 0 : index
    %c0_7 = arith.constant 0 : index
    %8 = vector.load %arg4[%c0_6, %c0_7] : memref<512x384xf32, #tpu.memory_space<vmem>>, vector<512x384xf32>
    %cst_8 = arith.constant dense<0.000000e+00> : vector<8x384xf32>
    %9 = tpu.matmul %7, %8, %cst_8 {dimension_numbers = #tpu.dot_dimension_numbers<[1], [0], [0], [1], [0, 0, 1, 1], [], []>} : vector<8x512xf32>, vector<512x384xf32>, vector<8x384xf32> -> vector<8x384xf32>
    %c0_9 = arith.constant 0 : index
    %c0_10 = arith.constant 0 : index
    %10 = vector.load %arg5[%c0_9, %c0_10] : memref<1x384xf32, #tpu.memory_space<vmem>>, vector<1x384xf32>
    %11 = vector.broadcast %10 : vector<1x384xf32> to vector<8x384xf32>
    %12 = arith.addf %9, %11 : vector<8x384xf32>
    %cst_11 = arith.constant 0.000000e+00 : f32
    %13 = vector.broadcast %cst_11 : f32 to vector<8x384xf32>
    %14 = arith.maximumf %12, %13 : vector<8x384xf32>
    %c0_12 = arith.constant 0 : index
    %c0_13 = arith.constant 0 : index
    %15 = vector.load %arg6[%c0_12, %c0_13] : memref<384x128xf32, #tpu.memory_space<vmem>>, vector<384x128xf32>
    %cst_14 = arith.constant dense<0.000000e+00> : vector<8x128xf32>
    %16 = tpu.matmul %14, %15, %cst_14 {dimension_numbers = #tpu.dot_dimension_numbers<[1], [0], [0], [1], [0, 0, 1, 1], [], []>} : vector<8x384xf32>, vector<384x128xf32>, vector<8x128xf32> -> vector<8x128xf32>
    %c0_15 = arith.constant 0 : index
    %c0_16 = arith.constant 0 : index
    %17 = vector.load %arg7[%c0_15, %c0_16] : memref<1x128xf32, #tpu.memory_space<vmem>>, vector<1x128xf32>
    %18 = vector.broadcast %17 : vector<1x128xf32> to vector<8x128xf32>
    %19 = arith.addf %16, %18 : vector<8x128xf32>
    %20 = math.tanh %19 : vector<8x128xf32>
    %c0_17 = arith.constant 0 : index
    %c0_18 = arith.constant 0 : index
    %21 = vector.load %arg8[%c0_17, %c0_18] : memref<8x128xf32, #tpu.memory_space<vmem>>, vector<8x128xf32>
    tpu.vector_store %arg8[%c0_17, %c0_18], %20 {strides = array<i32>} : memref<8x128xf32, #tpu.memory_space<vmem>>, vector<8x128xf32>,
    return
  }
  func.func @transform_0(%arg0: i32) -> (i32, i32) {
    %c0_i32 = arith.constant 0 : i32
    %c0_i32_0 = arith.constant 0 : i32
    return %arg0, %c0_i32 : i32, i32
  }
  func.func @transform_1(%arg0: i32) -> (i32, i32) {
    %c0_i32 = arith.constant 0 : i32
    %c0_i32_0 = arith.constant 0 : i32
    %c0_i32_1 = arith.constant 0 : i32
    return %c0_i32, %c0_i32_0 : i32, i32
  }
  func.func @transform_2(%arg0: i32) -> (i32, i32) {
    %c0_i32 = arith.constant 0 : i32
    %c0_i32_0 = arith.constant 0 : i32
    %c0_i32_1 = arith.constant 0 : i32
    return %c0_i32, %c0_i32_0 : i32, i32
  }
  func.func @transform_3(%arg0: i32) -> (i32, i32) {
    %c0_i32 = arith.constant 0 : i32
    %c0_i32_0 = arith.constant 0 : i32
    %c0_i32_1 = arith.constant 0 : i32
    return %c0_i32, %c0_i32_0 : i32, i32
  }
  func.func @transform_4(%arg0: i32) -> (i32, i32) {
    %c0_i32 = arith.constant 0 : i32
    %c0_i32_0 = arith.constant 0 : i32
    %c0_i32_1 = arith.constant 0 : i32
    return %c0_i32, %c0_i32_0 : i32, i32
  }
  func.func @transform_5(%arg0: i32) -> (i32, i32) {
    %c0_i32 = arith.constant 0 : i32
    %c0_i32_0 = arith.constant 0 : i32
    %c0_i32_1 = arith.constant 0 : i32
    return %c0_i32, %c0_i32_0 : i32, i32
  }
  func.func @transform_6(%arg0: i32) -> (i32, i32) {
    %c0_i32 = arith.constant 0 : i32
    %c0_i32_0 = arith.constant 0 : i32
    %c0_i32_1 = arith.constant 0 : i32
    return %c0_i32, %c0_i32_0 : i32, i32
  }
  func.func @transform_7(%arg0: i32) -> (i32, i32) {
    %c0_i32 = arith.constant 0 : i32
    %c0_i32_0 = arith.constant 0 : i32
    return %arg0, %c0_i32 : i32, i32
  }
}

</mosaic_0001>

<bundles_post_ra>
// kernel: tpu_custom_call.1
= control target key start
LH: loop header
LB: loop body
LE: loop exit
PB: predicated region body
PF: predicated region fallthrough
CT: control target
= control target key end

     0   :  { %12 = vsyncpa [#allocation3], 0  ;;  %s1075_s0 = inlined_call_operand.hbm [shape: f32[8,32], index: 0, kind: input, shape index: {}]   ;;  %s1076_s1 = inlined_call_operand.hbm [shape: f32[32,512], index: 1, kind: input, shape index: {}]   ;;  %s1077_s2 = inlined_call_operand.hbm [shape: f32[1,512], index: 2, kind: input, shape index: {}]   ;;  %s1078_s3 = inlined_call_operand.hbm [shape: f32[512,384], index: 3, kind: input, shape index: {}]   ;;  %s1079_s4 = inlined_call_operand.vmem [shape: f32[1,384], index: 4, kind: input, shape index: {}]   ;;  %s1080_s5 = inlined_call_operand.hbm [shape: f32[384,128], index: 5, kind: input, shape index: {}]   ;;  %s1081_s6 = inlined_call_operand.vmem [shape: f32[1,128], index: 6, kind: input, shape index: {}]   ;;  %s1082_s7 = inlined_call_operand.hbm [shape: f32[8,128], index: 7, kind: output, shape index: {}]  }
   0x1   :  { %13 = vsyncpa [#allocation6], 0 }
   0x2   :  { %14 = vsyncpa [#allocation9], 0  ;;  %s31_s26 = sshll.u32 %s1076_s1, 4  ;;  %s32_s26 = int_to_ptr.hbm [resolvable:$true] %s31_s26 }
   0x3   :  { %15 = vsyncpa [#allocation4], 0  ;;  %s963_s27 = smov [#allocation5]   ;;  %s55_s8 = sshll.u32 %s1078_s3, 4  ;;  %s56_s8 = int_to_ptr.hbm [resolvable:$true] %s55_s8 }
   0x4   :  { %s33_s28 = sshll.u32 %s963_s27, 4  ;;  %s964_s9 = smov 512   ;;  %s34_s28 = int_to_ptr.vmem [resolvable:$true] %s33_s28 }
   0x5   :  { %s965_s10 = smov 32   ;;  %s966_s11 = smov [#allocation8]  }
   0x6   :  { %39 = dma.hbm_to_vmem [thread:$0]  %s32_s26, 2048, %s34_s28, [#allocation6], %s964_s9, %s964_s9, %s965_s10  }
   0x7   :  { %s57_s12 = sshll.u32 %s966_s11, 4  ;;  %s967_s13 = smov 384   ;;  %s58_s12 = int_to_ptr.vmem [resolvable:$true] %s57_s12 }
   0x8   :  { %s968_s14 = smov 24   ;;  %s21_s16 = sshll.u32 %s1075_s0, 4  ;;  %s22_s16 = int_to_ptr.hbm [resolvable:$true] %s21_s16 }
   0x9   :  { %63 = dma.hbm_to_vmem [thread:$0]  %s56_s8, 24576, %s58_s12, [#allocation9], %s967_s13, %s967_s13, %s968_s14  }
   0xa   :  { %s969_s17 = smov [#allocation2]   ;;  %s45_s20 = sshll.u32 %s1077_s2, 4  ;;  %s46_s20 = int_to_ptr.hbm [resolvable:$true] %s45_s20 }
   0xb   :  { %s23_s18 = sshll.u32 %s969_s17, 4  ;;  %s970_s21 = smov [#allocation7]   ;;  %s24_s18 = int_to_ptr.vmem [resolvable:$true] %s23_s18 }
   0xc   :  { %26 = dma.hbm_to_vmem [thread:$0]  %s22_s16, 128, %s24_s18, [#allocation3]  }
   0xd   :  { %s47_s22 = sshll.u32 %s970_s21, 4  ;;  %s70_s25 = sshll.u32 %s1080_s5, 4  ;;  %s48_s22 = int_to_ptr.vmem [resolvable:$true] %s47_s22  ;;  %s71_s25 = int_to_ptr.hbm [resolvable:$true] %s70_s25 }
   0xe   :  { %50 = dma.hbm_to_vmem [thread:$0]  %s46_s20, 64, %s48_s22, [#allocation6]  }
   0xf   :  { %s971_s0 = smov [#allocation10]   ;;  %s972_s27 = smov 128  }
  0x10   :  { %s72_s26 = sshll.u32 %s971_s0, 4  ;;  %s973_s28 = smov 8   ;;  %s73_s26 = int_to_ptr.vmem [resolvable:$true] %s72_s26 }
  0x11   :  { %78 = dma.hbm_to_vmem [thread:$0]  %s71_s25, 6144, %s73_s26, [#allocation9], %s972_s27, %s972_s27, %s973_s28  }
  0x12   :  { %955 = dma.done.wait [#allocation3], 128  }
  0x13   :  { %956 = vsyncadd [#allocation3], 4294967168 }
  0x14   :  { %957 = dma.done.wait [#allocation6], 2112  }
  0x15   :  { %958 = vsyncadd [#allocation6], 4294965184 }
  0x16   :  { %959 = dma.done.wait [#allocation9], 30720  }
  0x17   :  { %960 = vsyncadd [#allocation9], 4294936576  ;;  %v114_v0 = vld [vmem:[#allocation5 + $0x60] sm:$0xff]  ;;  %v1030_v4 = vld [vmem:[#allocation2] sm:$0xff]  ;;  %vm128_vm0 = vcmask 261120   ;;  %s974_s30 = smov [#allocation11]  }
  0x18   :  { %v110_v1 = vld [vmem:[#allocation5 + $0x40] sm:$0xff]  ;;  %144 = vmatpush.msra.mxu3 %v114_v0  ;;  %v261_v5 = vld [vmem:[#allocation8 + $0x168] sm:$0xff]  ;;  %v258_v7 = vld [vmem:[#allocation8 + $0x150] sm:$0xff]  ;;  %s778_s8 = sshll.u32 %s974_s30, 4  ;;  %s780_s11 = sshll.u32 %s1082_s7, 4  ;;  %s779_s8 = int_to_ptr.vmem [resolvable:$true] %s778_s8  ;;  %s781_s11 = int_to_ptr.hbm [resolvable:$true] %s780_s11 }
  0x19   :  { %v106_v2 = vld [vmem:[#allocation5 + $0x20] sm:$0xff]  ;;  %v115_v6 = vld [vmem:[#allocation5 + $0x68] sm:$0xff]  ;;  %416 = vmatpush.msra.mxu0 %v261_v5  ;;  %v306_v11 = vld [vmem:[#allocation8 + $0x2d0] sm:$0xff] }
  0x1a   :  { %145 = vmatpush.msra.mxu3 %v110_v1  ;;  %v102_v3 = vld [vmem:[#allocation5] sm:$0xff]  ;;  %v309_v9 = vld [vmem:[#allocation8 + $0x2e8] sm:$0xff]  ;;  %v354_v17 = vld [vmem:[#allocation8 + $0x450] sm:$0xff] }
  0x1b   :  { %v255_v8 = vld [vmem:[#allocation8 + $0x138] sm:$0xff]  ;;  %v111_v10 = vld [vmem:[#allocation5 + $0x48] sm:$0xff]  ;;  %417 = vmatpush.msra.mxu0 %v258_v7  ;;  %436 = vmatpush.msra.mxu1 %v309_v9  ;;  %v246_v20 = vld [vmem:[#allocation8 + $0xf0] sm:$0xff] }
  0x1c   :  { %146 = vmatpush.msra.mxu3 %v106_v2  ;;  %v252_v12 = vld [vmem:[#allocation8 + $0x120] sm:$0xff]  ;;  %v303_v14 = vld [vmem:[#allocation8 + $0x2b8] sm:$0xff]  ;;  %v357_v15 = vld [vmem:[#allocation8 + $0x468] sm:$0xff] }
  0x1d   :  { %v107_v13 = vld [vmem:[#allocation5 + $0x28] sm:$0xff]  ;;  %418 = vmatpush.msra.mxu0 %v255_v8  ;;  %437 = vmatpush.msra.mxu1 %v306_v11  ;;  %v116_v21 = vld [vmem:[#allocation5 + $0x70] sm:$0xff]  ;;  %v243_v23 = vld [vmem:[#allocation8 + $0xd8] sm:$0xff] }
  0x1e   :  { %147 = vmatpush.msra.mxu3 %v102_v3  ;;  %v249_v16 = vld [vmem:[#allocation8 + $0x108] sm:$0xff]  ;;  %v300_v19 = vld [vmem:[#allocation8 + $0x2a0] sm:$0xff]  ;;  %456 = vmatpush.msra.mxu2 %v357_v15  ;;  %v351_v24 = vld [vmem:[#allocation8 + $0x438] sm:$0xff] }
  0x1f   :  { %792 = vmatmul.msk.f32.vlgmr.msra.gmra.mxu3 %vm128_vm0, %v1030_v4  ;;  %v103_v18 = vld [vmem:[#allocation5 + $0x8] sm:$0xff]  ;;  %419 = vmatpush.msra.mxu0 %v252_v12  ;;  %v112_v25 = vld [vmem:[#allocation5 + $0x50] sm:$0xff]  ;;  %v291_v30 = vld [vmem:[#allocation8 + $0x258] sm:$0xff] }
  0x20   :  { %164 = vmatpush.msrb.mxu3 %v115_v6  ;;  %438 = vmatpush.msra.mxu1 %v303_v14  ;;  %v297_v22 = vld [vmem:[#allocation8 + $0x288] sm:$0xff]  ;;  %v294_v26 = vld [vmem:[#allocation8 + $0x270] sm:$0xff]  ;;  %v240_v27 = vld [vmem:[#allocation8 + $0xc0] sm:$0xff] }
  0x21   :  { %420 = vmatpush.msra.mxu0 %v249_v16  ;;  %457 = vmatpush.msra.mxu2 %v354_v17  ;;  %v348_v28 = vld [vmem:[#allocation8 + $0x420] sm:$0xff]  ;;  %v108_v29 = vld [vmem:[#allocation5 + $0x30] sm:$0xff]  ;;  %v117_v36 = vld [vmem:[#allocation5 + $0x78] sm:$0xff] }
  0x22   :  { %165 = vmatpush.msrb.mxu3 %v111_v10  ;;  %439 = vmatpush.msra.mxu1 %v300_v19  ;;  %v237_v31 = vld [vmem:[#allocation8 + $0xa8] sm:$0xff]  ;;  %v288_v34 = vld [vmem:[#allocation8 + $0x240] sm:$0xff]  ;;  %v234_v35 = vld [vmem:[#allocation8 + $0x90] sm:$0xff] }
  0x23   :  { %421 = vmatpush.msra.mxu0 %v246_v20  ;;  %458 = vmatpush.msra.mxu2 %v351_v24  ;;  %v345_v32 = vld [vmem:[#allocation8 + $0x408] sm:$0xff]  ;;  %v231_v38 = vld [vmem:[#allocation8 + $0x78] sm:$0xff]  ;;  %v342_v39 = vld [vmem:[#allocation8 + $0x3f0] sm:$0xff] }
  0x24   :  { %166 = vmatpush.msrb.mxu3 %v107_v13  ;;  %440 = vmatpush.msra.mxu1 %v297_v22  ;;  %v104_v33 = vld [vmem:[#allocation5 + $0x10] sm:$0xff]  ;;  %v113_v40 = vld [vmem:[#allocation5 + $0x58] sm:$0xff]  ;;  %v228_v42 = vld [vmem:[#allocation8 + $0x60] sm:$0xff] }
  0x25   :  { %422 = vmatpush.msra.mxu0 %v243_v23  ;;  %459 = vmatpush.msra.mxu2 %v348_v28  ;;  %v285_v37 = vld [vmem:[#allocation8 + $0x228] sm:$0xff]  ;;  %v282_v41 = vld [vmem:[#allocation8 + $0x210] sm:$0xff]  ;;  %v339_v43 = vld [vmem:[#allocation8 + $0x3d8] sm:$0xff] }
  0x26   :  { %167 = vmatpush.msrb.mxu3 %v103_v18  ;;  %441 = vmatpush.msra.mxu1 %v294_v26  ;;  %v109_v44 = vld [vmem:[#allocation5 + $0x38] sm:$0xff]  ;;  %v225_v46 = vld [vmem:[#allocation8 + $0x48] sm:$0xff]  ;;  %v336_v47 = vld [vmem:[#allocation8 + $0x3c0] sm:$0xff] }
  0x27   :  { %793 = vmatmul.msk.f32.vlgmr.msrb.gmra.mxu3 %vm128_vm0, %v1030_v4  ;;  %423 = vmatpush.msra.mxu0 %v240_v27  ;;  %v279_v45 = vld [vmem:[#allocation8 + $0x1f8] sm:$0xff]  ;;  %v276_v49 = vld [vmem:[#allocation8 + $0x1e0] sm:$0xff]  ;;  %v222_v50 = vld [vmem:[#allocation8 + $0x30] sm:$0xff] }
  0x28   :  { %184 = vmatpush.msra.mxu3 %v116_v21  ;;  %442 = vmatpush.msra.mxu1 %v291_v30  ;;  %v105_v48 = vld [vmem:[#allocation5 + $0x18] sm:$0xff]  ;;  %v405_v51 = vld [vmem:[#allocation8 + $0x5e8] sm:$0xff]  ;;  %v216_v57 = vld [vmem:[#allocation8] sm:$0xff] }
  0x29   :  { %424 = vmatpush.msra.mxu0 %v237_v31  ;;  %460 = vmatpush.msra.mxu2 %v345_v32  ;;  %v273_v52 = vld [vmem:[#allocation8 + $0x1c8] sm:$0xff]  ;;  %v219_v53 = vld [vmem:[#allocation8 + $0x18] sm:$0xff]  ;;  %v402_v55 = vld [vmem:[#allocation8 + $0x5d0] sm:$0xff] }
  0x2a   :  { %185 = vmatpush.msra.mxu3 %v112_v25  ;;  %443 = vmatpush.msra.mxu1 %v288_v34  ;;  %v333_v54 = vld [vmem:[#allocation8 + $0x3a8] sm:$0xff]  ;;  %v270_v56 = vld [vmem:[#allocation8 + $0x1b0] sm:$0xff]  ;;  %v399_v59 = vld [vmem:[#allocation8 + $0x5b8] sm:$0xff] }
  0x2b   :  { %425 = vmatpush.msra.mxu0 %v234_v35  ;;  %461 = vmatpush.msra.mxu2 %v342_v39  ;;  %v330_v58 = vld [vmem:[#allocation8 + $0x390] sm:$0xff]  ;;  %v267_v61 = vld [vmem:[#allocation8 + $0x198] sm:$0xff]  ;;  %v396_v63 = vld [vmem:[#allocation8 + $0x5a0] sm:$0xff] }
  0x2c   :  { %186 = vmatpush.msra.mxu3 %v108_v29  ;;  %444 = vmatpush.msra.mxu1 %v285_v37  ;;  %v262_v60 = vld [vmem:[#allocation8 + $0x170] sm:$0xff]  ;;  %v327_v62 = vld [vmem:[#allocation8 + $0x378] sm:$0xff]  ;;  %v264_v1 = vld [vmem:[#allocation8 + $0x180] sm:$0xff] }
  0x2d   :  { %426 = vmatpush.msra.mxu0 %v231_v38  ;;  %462 = vmatpush.msra.mxu2 %v339_v43  ;;  %v259_v0 = vld [vmem:[#allocation8 + $0x158] sm:$0xff]  ;;  %v324_v2 = vld [vmem:[#allocation8 + $0x360] sm:$0xff]  ;;  %v393_v3 = vld [vmem:[#allocation8 + $0x588] sm:$0xff] }
  0x2e   :  { %187 = vmatpush.msra.mxu3 %v104_v33  ;;  %445 = vmatpush.msra.mxu1 %v282_v41  ;;  %v310_v5 = vld [vmem:[#allocation8 + $0x2f0] sm:$0xff]  ;;  %v321_v6 = vld [vmem:[#allocation8 + $0x348] sm:$0xff]  ;;  %v307_v9 = vld [vmem:[#allocation8 + $0x2d8] sm:$0xff] }
  0x2f   :  { %794 = vmatmul.msk.f32.vlgmr.msra.gmra.mxu3 %vm128_vm0, %v1030_v4  ;;  %427 = vmatpush.msra.mxu0 %v228_v42  ;;  %v390_v7 = vld [vmem:[#allocation8 + $0x570] sm:$0xff]  ;;  %v253_v8 = vld [vmem:[#allocation8 + $0x128] sm:$0xff]  ;;  %v387_v11 = vld [vmem:[#allocation8 + $0x558] sm:$0xff] }
  0x30   :  { %204 = vmatpush.msrb.mxu3 %v117_v36  ;;  %446 = vmatpush.msra.mxu1 %v279_v45  ;;  %v318_v10 = vld [vmem:[#allocation8 + $0x330] sm:$0xff]  ;;  %v304_v13 = vld [vmem:[#allocation8 + $0x2c0] sm:$0xff]  ;;  %v315_v14 = vld [vmem:[#allocation8 + $0x318] sm:$0xff] }
  0x31   :  { %428 = vmatpush.msra.mxu0 %v225_v46  ;;  %463 = vmatpush.msra.mxu2 %v336_v47  ;;  %v250_v12 = vld [vmem:[#allocation8 + $0x110] sm:$0xff]  ;;  %v384_v15 = vld [vmem:[#allocation8 + $0x540] sm:$0xff]  ;;  %v247_v16 = vld [vmem:[#allocation8 + $0xf8] sm:$0xff] }
  0x32   :  { %205 = vmatpush.msrb.mxu3 %v113_v40  ;;  %447 = vmatpush.msra.mxu1 %v276_v49  ;;  %v301_v17 = vld [vmem:[#allocation8 + $0x2a8] sm:$0xff]  ;;  %v312_v18 = vld [vmem:[#allocation8 + $0x300] sm:$0xff]  ;;  %v298_v21 = vld [vmem:[#allocation8 + $0x290] sm:$0xff] }
  0x33   :  { %429 = vmatpush.msra.mxu0 %v222_v50  ;;  %464 = vmatpush.msra.mxu2 %v333_v54  ;;  %v381_v19 = vld [vmem:[#allocation8 + $0x528] sm:$0xff]  ;;  %v244_v20 = vld [vmem:[#allocation8 + $0xe0] sm:$0xff]  ;;  %v358_v22 = vld [vmem:[#allocation8 + $0x470] sm:$0xff] }
  0x34   :  { %206 = vmatpush.msrb.mxu3 %v109_v44  ;;  %448 = vmatpush.msra.mxu1 %v273_v52  ;;  %v378_v23 = vld [vmem:[#allocation8 + $0x510] sm:$0xff]  ;;  %v241_v24 = vld [vmem:[#allocation8 + $0xc8] sm:$0xff]  ;;  %v295_v25 = vld [vmem:[#allocation8 + $0x278] sm:$0xff] }
  0x35   :  { %430 = vmatpush.msra.mxu0 %v219_v53  ;;  %465 = vmatpush.msra.mxu2 %v330_v58  ;;  %v355_v26 = vld [vmem:[#allocation8 + $0x458] sm:$0xff]  ;;  %v238_v28 = vld [vmem:[#allocation8 + $0xb0] sm:$0xff]  ;;  %v292_v29 = vld [vmem:[#allocation8 + $0x260] sm:$0xff] }
  0x36   :  { %207 = vmatpush.msrb.mxu3 %v105_v48  ;;  %449 = vmatpush.msra.mxu1 %v270_v56  ;;  %v375_v27 = vld [vmem:[#allocation8 + $0x4f8] sm:$0xff]  ;;  %v352_v30 = vld [vmem:[#allocation8 + $0x440] sm:$0xff]  ;;  %v289_v33 = vld [vmem:[#allocation8 + $0x248] sm:$0xff] }
  0x37   :  { %795 = vmatmul.msk.f32.vlgmr.msrb.gmra.mxu3 %vm128_vm0, %v1030_v4  ;;  %431 = vmatpush.msra.mxu0 %v216_v57  ;;  %v256_v4 = vld [vmem:[#allocation8 + $0x140] sm:$0xff]  ;;  %v235_v32 = vld [vmem:[#allocation8 + $0x98] sm:$0xff]  ;;  %v349_v34 = vld [vmem:[#allocation8 + $0x428] sm:$0xff] }
  0x38   :  { %476 = vmatpush.msra.mxu3 %v405_v51  ;;  %450 = vmatpush.msra.mxu1 %v267_v61  ;;  %v372_v31 = vld [vmem:[#allocation8 + $0x4e0] sm:$0xff]  ;;  %v369_v35 = vld [vmem:[#allocation8 + $0x4c8] sm:$0xff]  ;;  %v286_v37 = vld [vmem:[#allocation8 + $0x230] sm:$0xff] }
  0x39   :  { %496 = vmatpush.msrb.mxu0 %v262_v60  ;;  %466 = vmatpush.msra.mxu2 %v327_v62  ;;  %v232_v36 = vld [vmem:[#allocation8 + $0x80] sm:$0xff]  ;;  %v346_v38 = vld [vmem:[#allocation8 + $0x410] sm:$0xff]  ;;  %v229_v40 = vld [vmem:[#allocation8 + $0x68] sm:$0xff] }
  0x3a   :  { %477 = vmatpush.msra.mxu3 %v402_v55  ;;  %451 = vmatpush.msra.mxu1 %v264_v1  ;;  %v366_v39 = vld [vmem:[#allocation8 + $0x4b0] sm:$0xff]  ;;  %v363_v41 = vld [vmem:[#allocation8 + $0x498] sm:$0xff]  ;;  %v360_v43 = vld [vmem:[#allocation8 + $0x480] sm:$0xff] }
  0x3b   :  { %497 = vmatpush.msrb.mxu0 %v259_v0  ;;  %467 = vmatpush.msra.mxu2 %v324_v2  ;;  %v226_v42 = vld [vmem:[#allocation8 + $0x50] sm:$0xff]  ;;  %v223_v45 = vld [vmem:[#allocation8 + $0x38] sm:$0xff]  ;;  %v220_v49 = vld [vmem:[#allocation8 + $0x20] sm:$0xff] }
  0x3c   :  { %478 = vmatpush.msra.mxu3 %v399_v59  ;;  %516 = vmatpush.msrb.mxu1 %v310_v5  ;;  %v406_v44 = vld [vmem:[#allocation8 + $0x5f0] sm:$0xff]  ;;  %v283_v46 = vld [vmem:[#allocation8 + $0x218] sm:$0xff]  ;;  %v280_v50 = vld [vmem:[#allocation8 + $0x200] sm:$0xff] }
  0x3d   :  { %498 = vmatpush.msrb.mxu0 %v256_v4  ;;  %468 = vmatpush.msra.mxu2 %v321_v6  ;;  %v343_v47 = vld [vmem:[#allocation8 + $0x3f8] sm:$0xff]  ;;  %v340_v51 = vld [vmem:[#allocation8 + $0x3e0] sm:$0xff]  ;;  %v217_v53 = vld [vmem:[#allocation8 + $0x8] sm:$0xff] }
  0x3e   :  { %479 = vmatpush.msra.mxu3 %v396_v63  ;;  %517 = vmatpush.msrb.mxu1 %v307_v9  ;;  %v403_v48 = vld [vmem:[#allocation8 + $0x5d8] sm:$0xff]  ;;  %v400_v52 = vld [vmem:[#allocation8 + $0x5c0] sm:$0xff]  ;;  %v277_v54 = vld [vmem:[#allocation8 + $0x1e8] sm:$0xff] }
  0x3f   :  { %499 = vmatpush.msrb.mxu0 %v253_v8  ;;  %469 = vmatpush.msra.mxu2 %v318_v10  ;;  %v337_v55 = vld [vmem:[#allocation8 + $0x3c8] sm:$0xff]  ;;  %v274_v57 = vld [vmem:[#allocation8 + $0x1d0] sm:$0xff]  ;;  %v271_v60 = vld [vmem:[#allocation8 + $0x1b8] sm:$0xff] }
  0x40   :  { %480 = vmatpush.msra.mxu3 %v393_v3  ;;  %518 = vmatpush.msrb.mxu1 %v304_v13  ;;  %v397_v56 = vld [vmem:[#allocation8 + $0x5a8] sm:$0xff]  ;;  %v334_v58 = vld [vmem:[#allocation8 + $0x3b0] sm:$0xff]  ;;  %v331_v61 = vld [vmem:[#allocation8 + $0x398] sm:$0xff] }
  0x41   :  { %500 = vmatpush.msrb.mxu0 %v250_v12  ;;  %470 = vmatpush.msra.mxu2 %v315_v14  ;;  %v394_v59 = vld [vmem:[#allocation8 + $0x590] sm:$0xff]  ;;  %v391_v62 = vld [vmem:[#allocation8 + $0x578] sm:$0xff]  ;;  %v268_v63 = vld [vmem:[#allocation8 + $0x1a0] sm:$0xff] }
  0x42   :  { %481 = vmatpush.msra.mxu3 %v390_v7  ;;  %519 = vmatpush.msrb.mxu1 %v301_v17  ;;  %v328_v0 = vld [vmem:[#allocation8 + $0x380] sm:$0xff]  ;;  %v265_v2 = vld [vmem:[#allocation8 + $0x188] sm:$0xff]  ;;  %v322_v5 = vld [vmem:[#allocation8 + $0x350] sm:$0xff] }
  0x43   :  { %501 = vmatpush.msrb.mxu0 %v247_v16  ;;  %471 = vmatpush.msra.mxu2 %v312_v18  ;;  %v388_v1 = vld [vmem:[#allocation8 + $0x560] sm:$0xff]  ;;  %v325_v3 = vld [vmem:[#allocation8 + $0x368] sm:$0xff]  ;;  %v382_v6 = vld [vmem:[#allocation8 + $0x530] sm:$0xff] }
  0x44   :  { %482 = vmatpush.msra.mxu3 %v387_v11  ;;  %520 = vmatpush.msrb.mxu1 %v298_v21  ;;  %v385_v4 = vld [vmem:[#allocation8 + $0x548] sm:$0xff]  ;;  %v319_v7 = vld [vmem:[#allocation8 + $0x338] sm:$0xff]  ;;  %v316_v9 = vld [vmem:[#allocation8 + $0x320] sm:$0xff] }
  0x45   :  { %502 = vmatpush.msrb.mxu0 %v244_v20  ;;  %536 = vmatpush.msrb.mxu2 %v358_v22  ;;  %v379_v8 = vld [vmem:[#allocation8 + $0x518] sm:$0xff]  ;;  %v376_v10 = vld [vmem:[#allocation8 + $0x500] sm:$0xff]  ;;  %v313_v11 = vld [vmem:[#allocation8 + $0x308] sm:$0xff] }
  0x46   :  { %483 = vmatpush.msra.mxu3 %v384_v15  ;;  %521 = vmatpush.msrb.mxu1 %v295_v25  ;;  %v373_v12 = vld [vmem:[#allocation8 + $0x4e8] sm:$0xff]  ;;  %v370_v13 = vld [vmem:[#allocation8 + $0x4d0] sm:$0xff]  ;;  %v367_v14 = vld [vmem:[#allocation8 + $0x4b8] sm:$0xff] }
  0x47   :  { %503 = vmatpush.msrb.mxu0 %v241_v24  ;;  %537 = vmatpush.msrb.mxu2 %v355_v26  ;;  %v1040_v15 = vld [vmem:[#allocation7] sm:$0xf]  ;;  %v364_v16 = vld [vmem:[#allocation8 + $0x4a0] sm:$0xff]  ;;  %v361_v18 = vld [vmem:[#allocation8 + $0x488] sm:$0xff] }
  0x48   :  { %484 = vmatpush.msra.mxu3 %v381_v19  ;;  %522 = vmatpush.msrb.mxu1 %v292_v29  ;;  %v120_v17 = vperm.slane %v1040_v15, 0  ;;  %v263_v22 = vld [vmem:[#allocation8 + $0x178] sm:$0xff]  ;;  %v121_v24 = vperm.slane %v1040_v15, 1  ;;  %v257_v25 = vld [vmem:[#allocation8 + $0x148] sm:$0xff] }
  0x49   :  { %504 = vmatpush.msrb.mxu0 %v238_v28  ;;  %538 = vmatpush.msrb.mxu2 %v352_v30  ;;  %v254_v28 = vld [vmem:[#allocation8 + $0x130] sm:$0xff]  ;;  %v251_v30 = vld [vmem:[#allocation8 + $0x118] sm:$0xff] }
  0x4a   :  { %485 = vmatpush.msra.mxu3 %v378_v23  ;;  %523 = vmatpush.msrb.mxu1 %v289_v33  ;;  %v260_v23 = vld [vmem:[#allocation8 + $0x160] sm:$0xff] }
  0x4b   :  { %505 = vmatpush.msrb.mxu0 %v235_v32  ;;  %539 = vmatpush.msrb.mxu2 %v349_v34  ;;  %v248_v32 = vld [vmem:[#allocation8 + $0x100] sm:$0xff]  ;;  %v122_v34 = vperm.slane %v1040_v15, 2 }
  0x4c   :  { %486 = vmatpush.msra.mxu3 %v375_v27  ;;  %524 = vmatpush.msrb.mxu1 %v286_v37  ;;  %v308_v33 = vld [vmem:[#allocation8 + $0x2e0] sm:$0xff] }
  0x4d   :  { %506 = vmatpush.msrb.mxu0 %v232_v36  ;;  %540 = vmatpush.msrb.mxu2 %v346_v38  ;;  %v305_v36 = vld [vmem:[#allocation8 + $0x2c8] sm:$0xff] }
  0x4e   :  { %487 = vmatpush.msra.mxu3 %v372_v31  ;;  %525 = vmatpush.msrb.mxu1 %v283_v46  ;;  %v311_v31 = vld [vmem:[#allocation8 + $0x2f8] sm:$0xff]  ;;  %v296_v46 = vld [vmem:[#allocation8 + $0x280] sm:$0xff] }
  0x4f   :  { %507 = vmatpush.msrb.mxu0 %v229_v40  ;;  %541 = vmatpush.msrb.mxu2 %v343_v47  ;;  %v302_v40 = vld [vmem:[#allocation8 + $0x2b0] sm:$0xff]  ;;  %v123_v47 = vperm.slane %v1040_v15, 3  ;;  %v392_v15 = vld [vmem:[#allocation8 + $0x580] sm:$0xff] }
  0x50   :  { %488 = vmatpush.msra.mxu3 %v369_v35  ;;  %526 = vmatpush.msrb.mxu1 %v280_v50  ;;  %v245_v35 = vld [vmem:[#allocation8 + $0xe8] sm:$0xff] }
  0x51   :  { %508 = vmatpush.msrb.mxu0 %v226_v42  ;;  %542 = vmatpush.msrb.mxu2 %v340_v51  ;;  %v239_v42 = vld [vmem:[#allocation8 + $0xb8] sm:$0xff]  ;;  %v293_v50 = vld [vmem:[#allocation8 + $0x268] sm:$0xff] }
  0x52   :  { %489 = vmatpush.msra.mxu3 %v366_v39  ;;  %527 = vmatpush.msrb.mxu1 %v277_v54  ;;  %v242_v39 = vld [vmem:[#allocation8 + $0xd0] sm:$0xff] }
  0x53   :  { %509 = vmatpush.msrb.mxu0 %v223_v45  ;;  %543 = vmatpush.msrb.mxu2 %v337_v55  ;;  %v236_v45 = vld [vmem:[#allocation8 + $0xa0] sm:$0xff]  ;;  %v230_v54 = vld [vmem:[#allocation8 + $0x70] sm:$0xff] }
  0x54   :  { %490 = vmatpush.msra.mxu3 %v363_v41  ;;  %528 = vmatpush.msrb.mxu1 %v274_v57  ;;  %v290_v55 = vld [vmem:[#allocation8 + $0x250] sm:$0xff] }
  0x55   :  { %510 = vmatpush.msrb.mxu0 %v220_v49  ;;  %544 = vmatpush.msrb.mxu2 %v334_v58  ;;  %v233_v49 = vld [vmem:[#allocation8 + $0x88] sm:$0xff]  ;;  %v227_v58 = vld [vmem:[#allocation8 + $0x58] sm:$0xff] }
  0x56   :  { %491 = vmatpush.msra.mxu3 %v360_v43  ;;  %529 = vmatpush.msrb.mxu1 %v271_v60  ;;  %v299_v43 = vld [vmem:[#allocation8 + $0x298] sm:$0xff] }
  0x57   :  { %511 = vmatpush.msrb.mxu0 %v217_v53  ;;  %545 = vmatpush.msrb.mxu2 %v331_v61  ;;  %v347_v60 = vld [vmem:[#allocation8 + $0x418] sm:$0xff] }
  0x58   :  { %556 = vmatpush.msrb.mxu3 %v406_v44  ;;  %530 = vmatpush.msrb.mxu1 %v268_v63  ;;  %v359_v44 = vld [vmem:[#allocation8 + $0x478] sm:$0xff]  ;;  %v284_v63 = vld [vmem:[#allocation8 + $0x220] sm:$0xff] }
  0x59   :  { %546 = vmatpush.msrb.mxu2 %v328_v0  ;;  %v407_v61 = vld [vmem:[#allocation8 + $0x5f8] sm:$0xff]  ;;  %v344_v0 = vld [vmem:[#allocation8 + $0x400] sm:$0xff] }
  0x5a   :  { %557 = vmatpush.msrb.mxu3 %v403_v48  ;;  %531 = vmatpush.msrb.mxu1 %v265_v2  ;;  %v356_v48 = vld [vmem:[#allocation8 + $0x460] sm:$0xff]  ;;  %v221_v2 = vld [vmem:[#allocation8 + $0x28] sm:$0xff] }
  0x5b   :  { %547 = vmatpush.msrb.mxu2 %v325_v3  ;;  %v281_v3 = vld [vmem:[#allocation8 + $0x208] sm:$0xff] }
  0x5c   :  { %558 = vmatpush.msrb.mxu3 %v400_v52  ;;  %v353_v52 = vld [vmem:[#allocation8 + $0x448] sm:$0xff] }
  0x5d   :  { %548 = vmatpush.msrb.mxu2 %v322_v5  ;;  %v401_v5 = vld [vmem:[#allocation8 + $0x5c8] sm:$0xff] }
  0x5e   :  { %559 = vmatpush.msrb.mxu3 %v397_v56  ;;  %v350_v56 = vld [vmem:[#allocation8 + $0x430] sm:$0xff] }
  0x5f   :  { %549 = vmatpush.msrb.mxu2 %v319_v7  ;;  %v278_v7 = vld [vmem:[#allocation8 + $0x1f0] sm:$0xff] }
  0x60   :  { %560 = vmatpush.msrb.mxu3 %v394_v59  ;;  %v287_v59 = vld [vmem:[#allocation8 + $0x238] sm:$0xff] }
  0x61   :  { %550 = vmatpush.msrb.mxu2 %v316_v9  ;;  %v398_v9 = vld [vmem:[#allocation8 + $0x5b0] sm:$0xff] }
  0x62   :  { %561 = vmatpush.msrb.mxu3 %v391_v62  ;;  %v224_v62 = vld [vmem:[#allocation8 + $0x40] sm:$0xff] }
  0x63   :  { %551 = vmatpush.msrb.mxu2 %v313_v11  ;;  %v335_v11 = vld [vmem:[#allocation8 + $0x3b8] sm:$0xff] }
  0x64   :  { %562 = vmatpush.msrb.mxu3 %v388_v1  ;;  %v404_v1 = vld [vmem:[#allocation8 + $0x5e0] sm:$0xff] }
  0x66   :  { %563 = vmatpush.msrb.mxu3 %v385_v4  ;;  %v341_v4 = vld [vmem:[#allocation8 + $0x3e8] sm:$0xff] }
  0x68   :  { %564 = vmatpush.msrb.mxu3 %v382_v6  ;;  %v218_v6 = vld [vmem:[#allocation8 + $0x10] sm:$0xff] }
  0x6a   :  { %565 = vmatpush.msrb.mxu3 %v379_v8  ;;  %v338_v8 = vld [vmem:[#allocation8 + $0x3d0] sm:$0xff] }
  0x6c   :  { %566 = vmatpush.msrb.mxu3 %v376_v10  ;;  %v275_v10 = vld [vmem:[#allocation8 + $0x1d8] sm:$0xff] }
  0x6e   :  { %567 = vmatpush.msrb.mxu3 %v373_v12  ;;  %v395_v12 = vld [vmem:[#allocation8 + $0x598] sm:$0xff] }
  0x70   :  { %568 = vmatpush.msrb.mxu3 %v370_v13  ;;  %v272_v13 = vld [vmem:[#allocation8 + $0x1c0] sm:$0xff] }
  0x72   :  { %569 = vmatpush.msrb.mxu3 %v367_v14  ;;  %v332_v14 = vld [vmem:[#allocation8 + $0x3a0] sm:$0xff] }
  0x74   :  { %570 = vmatpush.msrb.mxu3 %v364_v16  ;;  %v269_v16 = vld [vmem:[#allocation8 + $0x1a8] sm:$0xff] }
  0x76   :  { %571 = vmatpush.msrb.mxu3 %v361_v18  ;;  %v389_v18 = vld [vmem:[#allocation8 + $0x568] sm:$0xff] }
  0xa2   :  { %v149_v19 = vpop.f32.mrf.mxu3 }
  0xa3   :  { %v150_v20 = vadd.f32 %v149_v19, %v120_v17  ;;  %v329_v17 = vld [vmem:[#allocation8 + $0x388] sm:$0xff]  ;;  %v266_v19 = vld [vmem:[#allocation8 + $0x190] sm:$0xff] }
  0xa5   :  { %v1043_v21 = vmax.f32 %v150_v20, 0.0  ;;  %v326_v20 = vld [vmem:[#allocation8 + $0x370] sm:$0xff] }
  0xa7   :  { %432 = vmatmul.f32.vlgmr.msra.gmra.mxu0 %v1043_v21 }
  0xa8   :  { %576 = vmatpush.msra.mxu0 %v263_v22  ;;  %v386_v22 = vld [vmem:[#allocation8 + $0x550] sm:$0xff] }
  0xaa   :  { %577 = vmatpush.msra.mxu0 %v260_v23  ;;  %v169_v26 = vpop.f32.mrf.mxu3  ;;  %v383_v23 = vld [vmem:[#allocation8 + $0x538] sm:$0xff] }
  0xab   :  { %v170_v27 = vadd.f32 %v169_v26, %v121_v24  ;;  %v320_v24 = vld [vmem:[#allocation8 + $0x340] sm:$0xff]  ;;  %v317_v26 = vld [vmem:[#allocation8 + $0x328] sm:$0xff] }
  0xac   :  { %578 = vmatpush.msra.mxu0 %v257_v25  ;;  %v380_v25 = vld [vmem:[#allocation8 + $0x520] sm:$0xff] }
  0xad   :  { %v1047_v29 = vmax.f32 %v170_v27, 0.0  ;;  %v377_v27 = vld [vmem:[#allocation8 + $0x508] sm:$0xff] }
  0xae   :  { %579 = vmatpush.msra.mxu0 %v254_v28  ;;  %v314_v28 = vld [vmem:[#allocation8 + $0x310] sm:$0xff] }
  0xaf   :  { %452 = vmatmul.f32.vlgmr.msra.gmra.mxu1 %v1047_v29  ;;  %512 = vmatmul.f32.vlgmr.msrb.gmra.mxu0 %v1043_v21 }
  0xb0   :  { %580 = vmatpush.msra.mxu0 %v251_v30  ;;  %596 = vmatpush.msra.mxu1 %v311_v31  ;;  %v374_v30 = vld [vmem:[#allocation8 + $0x4f0] sm:$0xff]  ;;  %v371_v31 = vld [vmem:[#allocation8 + $0x4d8] sm:$0xff] }
  0xb2   :  { %581 = vmatpush.msra.mxu0 %v248_v32  ;;  %597 = vmatpush.msra.mxu1 %v308_v33  ;;  %v189_v37 = vpop.f32.mrf.mxu3  ;;  %v368_v32 = vld [vmem:[#allocation8 + $0x4c0] sm:$0xff]  ;;  %v362_v33 = vld [vmem:[#allocation8 + $0x490] sm:$0xff] }
  0xb3   :  { %v190_v38 = vadd.f32 %v189_v37, %v122_v34  ;;  %v674_v34 = vld [vmem:[#allocation10 + $0x78] sm:$0xff]  ;;  %v671_v37 = vld [vmem:[#allocation10 + $0x60] sm:$0xff] }
  0xb4   :  { %582 = vmatpush.msra.mxu0 %v245_v35  ;;  %598 = vmatpush.msra.mxu1 %v305_v36  ;;  %v673_v35 = vld [vmem:[#allocation10 + $0x70] sm:$0xff]  ;;  %v672_v36 = vld [vmem:[#allocation10 + $0x68] sm:$0xff] }
  0xb5   :  { %v1052_v41 = vmax.f32 %v190_v38, 0.0  ;;  %v690_v38 = vld [vmem:[#allocation10 + $0xf8] sm:$0xff] }
  0xb6   :  { %583 = vmatpush.msra.mxu0 %v242_v39  ;;  %599 = vmatpush.msra.mxu1 %v302_v40  ;;  %v689_v39 = vld [vmem:[#allocation10 + $0xf0] sm:$0xff]  ;;  %v670_v40 = vld [vmem:[#allocation10 + $0x58] sm:$0xff] }
  0xb7   :  { %472 = vmatmul.f32.vlgmr.msra.gmra.mxu2 %v1052_v41  ;;  %532 = vmatmul.f32.vlgmr.msrb.gmra.mxu1 %v1047_v29 }
  0xb8   :  { %584 = vmatpush.msra.mxu0 %v239_v42  ;;  %600 = vmatpush.msra.mxu1 %v299_v43  ;;  %v668_v42 = vld [vmem:[#allocation10 + $0x48] sm:$0xff] }
  0xb9   :  { %616 = vmatpush.msra.mxu2 %v359_v44  ;;  %v688_v43 = vld [vmem:[#allocation10 + $0xe8] sm:$0xff]  ;;  %v667_v44 = vld [vmem:[#allocation10 + $0x40] sm:$0xff] }
  0xba   :  { %585 = vmatpush.msra.mxu0 %v236_v45  ;;  %601 = vmatpush.msra.mxu1 %v296_v46  ;;  %v209_v51 = vpop.f32.mrf.mxu3  ;;  %v687_v45 = vld [vmem:[#allocation10 + $0xe0] sm:$0xff]  ;;  %v666_v46 = vld [vmem:[#allocation10 + $0x38] sm:$0xff] }
  0xbb   :  { %617 = vmatpush.msra.mxu2 %v356_v48  ;;  %v210_v53 = vadd.f32 %v209_v51, %v123_v47  ;;  %v686_v47 = vld [vmem:[#allocation10 + $0xd8] sm:$0xff]  ;;  %v665_v48 = vld [vmem:[#allocation10 + $0x30] sm:$0xff]  ;;  %v684_v51 = vld [vmem:[#allocation10 + $0xc8] sm:$0xff] }
  0xbc   :  { %586 = vmatpush.msra.mxu0 %v233_v49  ;;  %602 = vmatpush.msra.mxu1 %v293_v50  ;;  %v685_v49 = vld [vmem:[#allocation10 + $0xd0] sm:$0xff]  ;;  %v664_v50 = vld [vmem:[#allocation10 + $0x28] sm:$0xff] }
  0xbd   :  { %v1057_v57 = vmax.f32 %v210_v53, 0.0  ;;  %618 = vmatpush.msra.mxu2 %v353_v52  ;;  %v663_v52 = vld [vmem:[#allocation10 + $0x20] sm:$0xff] }
  0xbe   :  { %587 = vmatpush.msra.mxu0 %v230_v54  ;;  %603 = vmatpush.msra.mxu1 %v290_v55  ;;  %v683_v53 = vld [vmem:[#allocation10 + $0xc0] sm:$0xff]  ;;  %v662_v54 = vld [vmem:[#allocation10 + $0x18] sm:$0xff] }
  0xbf   :  { %619 = vmatpush.msra.mxu2 %v350_v56  ;;  %492 = vmatmul.f32.vlgmr.msra.gmra.mxu3 %v1057_v57  ;;  %v682_v55 = vld [vmem:[#allocation10 + $0xb8] sm:$0xff]  ;;  %v661_v56 = vld [vmem:[#allocation10 + $0x10] sm:$0xff] }
  0xc0   :  { %552 = vmatmul.f32.vlgmr.msrb.gmra.mxu2 %v1052_v41  ;;  %588 = vmatpush.msra.mxu0 %v227_v58  ;;  %v660_v58 = vld [vmem:[#allocation10 + $0x8] sm:$0xff] }
  0xc1   :  { %604 = vmatpush.msra.mxu1 %v287_v59  ;;  %620 = vmatpush.msra.mxu2 %v347_v60  ;;  %v680_v59 = vld [vmem:[#allocation10 + $0xa8] sm:$0xff]  ;;  %v659_v60 = vld [vmem:[#allocation10] sm:$0xff] }
  0xc2   :  { %636 = vmatpush.msra.mxu3 %v407_v61  ;;  %589 = vmatpush.msra.mxu0 %v224_v62  ;;  %v679_v61 = vld [vmem:[#allocation10 + $0xa0] sm:$0xff]  ;;  %v706_v62 = vld [vmem:[#allocation10 + $0x178] sm:$0xff] }
  0xc3   :  { %605 = vmatpush.msra.mxu1 %v284_v63  ;;  %621 = vmatpush.msra.mxu2 %v344_v0  ;;  %v678_v63 = vld [vmem:[#allocation10 + $0x98] sm:$0xff]  ;;  %v705_v0 = vld [vmem:[#allocation10 + $0x170] sm:$0xff] }
  0xc4   :  { %637 = vmatpush.msra.mxu3 %v404_v1  ;;  %590 = vmatpush.msra.mxu0 %v221_v2  ;;  %v677_v1 = vld [vmem:[#allocation10 + $0x90] sm:$0xff]  ;;  %v704_v2 = vld [vmem:[#allocation10 + $0x168] sm:$0xff] }
  0xc5   :  { %606 = vmatpush.msra.mxu1 %v281_v3  ;;  %622 = vmatpush.msra.mxu2 %v341_v4  ;;  %v676_v3 = vld [vmem:[#allocation10 + $0x88] sm:$0xff]  ;;  %v703_v4 = vld [vmem:[#allocation10 + $0x160] sm:$0xff] }
  0xc6   :  { %638 = vmatpush.msra.mxu3 %v401_v5  ;;  %591 = vmatpush.msra.mxu0 %v218_v6  ;;  %v675_v5 = vld [vmem:[#allocation10 + $0x80] sm:$0xff]  ;;  %v702_v6 = vld [vmem:[#allocation10 + $0x158] sm:$0xff] }
  0xc7   :  { %607 = vmatpush.msra.mxu1 %v278_v7  ;;  %623 = vmatpush.msra.mxu2 %v338_v8  ;;  %v701_v7 = vld [vmem:[#allocation10 + $0x150] sm:$0xff]  ;;  %v700_v8 = vld [vmem:[#allocation10 + $0x148] sm:$0xff] }
  0xc8   :  { %639 = vmatpush.msra.mxu3 %v398_v9  ;;  %592 = vmatmul.f32.vlgmr.msra.gmra.mxu0 %v1043_v21  ;;  %v323_v21 = vld [vmem:[#allocation8 + $0x358] sm:$0xff]  ;;  %v699_v9 = vld [vmem:[#allocation10 + $0x140] sm:$0xff] }
  0xc9   :  { %572 = vmatmul.f32.vlgmr.msrb.gmra.mxu3 %v1057_v57  ;;  %608 = vmatpush.msra.mxu1 %v275_v10  ;;  %v408_v10 = vld [vmem:[%s1079_s4] sm:$0x7] }
  0xca   :  { %624 = vmatpush.msra.mxu2 %v335_v11  ;;  %640 = vmatpush.msra.mxu3 %v395_v12  ;;  %v698_v11 = vld [vmem:[#allocation10 + $0x138] sm:$0xff]  ;;  %v410_v12 = vperm.slane %v408_v10, 0 }
  0xcb   :  { %609 = vmatpush.msra.mxu1 %v272_v13  ;;  %711 = vmatpush.msrb.mxu0 %v674_v34 }
  0xcc   :  { %625 = vmatpush.msra.mxu2 %v332_v14  ;;  %641 = vmatpush.msra.mxu3 %v392_v15  ;;  %v697_v14 = vld [vmem:[#allocation10 + $0x130] sm:$0xff] }
  0xcd   :  { %610 = vmatpush.msra.mxu1 %v269_v16  ;;  %712 = vmatpush.msrb.mxu0 %v673_v35 }
  0xce   :  { %626 = vmatpush.msra.mxu2 %v329_v17  ;;  %642 = vmatpush.msra.mxu3 %v389_v18  ;;  %v696_v17 = vld [vmem:[#allocation10 + $0x128] sm:$0xff]  ;;  %v695_v18 = vld [vmem:[#allocation10 + $0x120] sm:$0xff] }
  0xcf   :  { %611 = vmatpush.msra.mxu1 %v266_v19  ;;  %713 = vmatpush.msrb.mxu0 %v672_v36 }
  0xd0   :  { %627 = vmatpush.msra.mxu2 %v326_v20  ;;  %643 = vmatpush.msra.mxu3 %v386_v22  ;;  %v694_v22 = vld [vmem:[#allocation10 + $0x118] sm:$0xff] }
  0xd1   :  { %612 = vmatmul.f32.vlgmr.msra.gmra.mxu1 %v1047_v29  ;;  %v365_v29 = vld [vmem:[#allocation8 + $0x4a8] sm:$0xff]  ;;  %714 = vmatpush.msrb.mxu0 %v671_v37 }
  0xd2   :  { %628 = vmatpush.msra.mxu2 %v323_v21  ;;  %644 = vmatpush.msra.mxu3 %v383_v23 }
  0xd3   :  { %731 = vmatpush.msrb.mxu1 %v690_v38  ;;  %715 = vmatpush.msrb.mxu0 %v670_v40 }
  0xd4   :  { %629 = vmatpush.msra.mxu2 %v320_v24  ;;  %645 = vmatpush.msra.mxu3 %v380_v25  ;;  %v411_v24 = vperm.slane %v408_v10, 1 }
  0xd5   :  { %732 = vmatpush.msrb.mxu1 %v689_v39  ;;  %v412_v39 = vperm.slane %v408_v10, 2 }
  0xd6   :  { %630 = vmatpush.msra.mxu2 %v317_v26  ;;  %646 = vmatpush.msra.mxu3 %v377_v27  ;;  %v693_v26 = vld [vmem:[#allocation10 + $0x110] sm:$0xff] }
  0xd7   :  { %733 = vmatpush.msrb.mxu1 %v688_v43 }
  0xd8   :  { %631 = vmatpush.msra.mxu2 %v314_v28  ;;  %647 = vmatpush.msra.mxu3 %v374_v30  ;;  %v692_v30 = vld [vmem:[#allocation10 + $0x108] sm:$0xff] }
  0xd9   :  { %632 = vmatmul.f32.vlgmr.msra.gmra.mxu2 %v1052_v41  ;;  %v669_v41 = vld [vmem:[#allocation10 + $0x50] sm:$0xff]  ;;  %734 = vmatpush.msrb.mxu1 %v687_v45 }
  0xda   :  { %648 = vmatpush.msra.mxu3 %v371_v31  ;;  %716 = vmatpush.msrb.mxu0 %v669_v41 }
  0xdb   :  { %735 = vmatpush.msrb.mxu1 %v686_v47  ;;  %751 = vmatpush.msrb.mxu2 %v706_v62 }
  0xdc   :  { %649 = vmatpush.msra.mxu3 %v368_v32  ;;  %717 = vmatpush.msrb.mxu0 %v668_v42 }
  0xdd   :  { %736 = vmatpush.msrb.mxu1 %v685_v49  ;;  %752 = vmatpush.msrb.mxu2 %v705_v0  ;;  %v808_v49 = vld [vmem:[%s1081_s6] ss:$0 sm:$0xff] }
  0xde   :  { %650 = vmatpush.msra.mxu3 %v365_v29  ;;  %718 = vmatpush.msrb.mxu0 %v667_v44  ;;  %v691_v29 = vld [vmem:[#allocation10 + $0x100] sm:$0xff] }
  0xdf   :  { %737 = vmatpush.msrb.mxu1 %v684_v51  ;;  %753 = vmatpush.msrb.mxu2 %v704_v2 }
  0xe0   :  { %651 = vmatpush.msra.mxu3 %v362_v33  ;;  %719 = vmatpush.msrb.mxu0 %v666_v46 }
  0xe1   :  { %652 = vmatmul.f32.vlgmr.msra.gmra.mxu3 %v1057_v57  ;;  %738 = vmatpush.msrb.mxu1 %v683_v53  ;;  %v681_v57 = vld [vmem:[#allocation10 + $0xb0] sm:$0xff] }
  0xe2   :  { %720 = vmatpush.msrb.mxu0 %v665_v48  ;;  %754 = vmatpush.msrb.mxu2 %v703_v4 }
  0xe3   :  { %739 = vmatpush.msrb.mxu1 %v682_v55 }
  0xe4   :  { %721 = vmatpush.msrb.mxu0 %v664_v50  ;;  %755 = vmatpush.msrb.mxu2 %v702_v6 }
  0xe5   :  { %740 = vmatpush.msrb.mxu1 %v681_v57 }
  0xe6   :  { %722 = vmatpush.msrb.mxu0 %v663_v52  ;;  %756 = vmatpush.msrb.mxu2 %v701_v7 }
  0xe7   :  { %741 = vmatpush.msrb.mxu1 %v680_v59 }
  0xe8   :  { %723 = vmatpush.msrb.mxu0 %v662_v54  ;;  %757 = vmatpush.msrb.mxu2 %v700_v8 }
  0xe9   :  { %742 = vmatpush.msrb.mxu1 %v679_v61 }
  0xea   :  { %724 = vmatpush.msrb.mxu0 %v661_v56  ;;  %758 = vmatpush.msrb.mxu2 %v699_v9 }
  0xeb   :  { %743 = vmatpush.msrb.mxu1 %v678_v63 }
  0xec   :  { %725 = vmatpush.msrb.mxu0 %v660_v58  ;;  %759 = vmatpush.msrb.mxu2 %v698_v11 }
  0xed   :  { %744 = vmatpush.msrb.mxu1 %v677_v1 }
  0xee   :  { %726 = vmatpush.msrb.mxu0 %v659_v60  ;;  %760 = vmatpush.msrb.mxu2 %v697_v14 }
  0xef   :  { %745 = vmatpush.msrb.mxu1 %v676_v3 }
  0xf0   :  { %761 = vmatpush.msrb.mxu2 %v696_v17 }
  0xf1   :  { %746 = vmatpush.msrb.mxu1 %v675_v5 }
  0xf2   :  { %762 = vmatpush.msrb.mxu2 %v695_v18 }
  0xf4   :  { %763 = vmatpush.msrb.mxu2 %v694_v22 }
  0xf6   :  { %764 = vmatpush.msrb.mxu2 %v693_v26 }
  0xf8   :  { %765 = vmatpush.msrb.mxu2 %v692_v30 }
  0xfa   :  { %766 = vmatpush.msrb.mxu2 %v691_v29 }
 0x124   :  { %v433_v13 = vpop.f32.mrf.mxu0 }
 0x125   :  { %v434_v16 = vadd.f32 %v433_v13, %v410_v12 }
 0x12c   :  { %v453_v15 = vpop.f32.mrf.mxu1  ;;  %v513_v27 = vpop.f32.mrf.mxu0 }
 0x12d   :  { %v454_v20 = vadd.f32 %v453_v15, %v434_v16  ;;  %v514_v32 = vadd.f32 %v513_v27, %v411_v24 }
 0x134   :  { %v533_v31 = vpop.f32.mrf.mxu1 }
 0x135   :  { %v534_v34 = vadd.f32 %v533_v31, %v514_v32 }
 0x13a   :  { %v473_v19 = vpop.f32.mrf.mxu2 }
 0x13b   :  { %v474_v21 = vadd.f32 %v473_v19, %v454_v20 }
 0x142   :  { %v493_v23 = vpop.f32.mrf.mxu3 }
 0x143   :  { %v494_v25 = vadd.f32 %v493_v23, %v474_v21  ;;  %v553_v33 = vpop.f32.mrf.mxu2 }
 0x144   :  { %v554_v35 = vadd.f32 %v553_v33, %v534_v34 }
 0x145   :  { %v656_v28 = vmax.f32 %v494_v25, 0.0  ;;  %v593_v40 = vpop.f32.mrf.mxu0 }
 0x146   :  { %v594_v42 = vadd.f32 %v593_v40, %v412_v39 }
 0x147   :  { %727 = vmatmul.f32.vlgmr.msrb.gmra.mxu0 %v656_v28 }
 0x14c   :  { %v573_v36 = vpop.f32.mrf.mxu3 }
 0x14d   :  { %v574_v37 = vadd.f32 %v573_v36, %v554_v35 }
 0x14e   :  { %v613_v41 = vpop.f32.mrf.mxu1 }
 0x14f   :  { %v657_v38 = vmax.f32 %v574_v37, 0.0  ;;  %v614_v44 = vadd.f32 %v613_v41, %v594_v42 }
 0x151   :  { %747 = vmatmul.f32.vlgmr.msrb.gmra.mxu1 %v657_v38 }
 0x15c   :  { %v633_v43 = vpop.f32.mrf.mxu2 }
 0x15d   :  { %v634_v45 = vadd.f32 %v633_v43, %v614_v44 }
 0x164   :  { %v653_v46 = vpop.f32.mrf.mxu3 }
 0x165   :  { %v654_v47 = vadd.f32 %v653_v46, %v634_v45 }
 0x167   :  { %v658_v48 = vmax.f32 %v654_v47, 0.0 }
 0x169   :  { %767 = vmatmul.f32.vlgmr.msrb.gmra.mxu2 %v658_v48 }
 0x1c4   :  { %v728_v50 = vpop.f32.mrf.mxu0 }
 0x1c5   :  { %v729_v52 = vadd.f32 %v808_v49, %v728_v50 }
 0x1ce   :  { %v748_v51 = vpop.f32.mrf.mxu1 }
 0x1cf   :  { %v749_v53 = vadd.f32 %v748_v51, %v729_v52 }
 0x1ec   :  { %v768_v54 = vpop.f32.mrf.mxu2 }
 0x1ed   :  { %v769_v55 = vadd.f32 %v768_v54, %v749_v53 }
 0x1ef   :  { %809 = vtanh.f32 %v769_v55 }
 0x1f5   :  { %v810_v56 = vpop.eup %809 }
 0x1f6   :  { %772 = vst [vmem:[#allocation11] sm:$0xff] %v810_v56 }
 0x1f7   :  { %783 = dma.vmem_to_hbm [thread:$0]  %s779_s8, 128, %s781_s11, [#allocation4]  }
 0x1f8   :  { %961 = dma.done.wait [#allocation4], 128  }
 0x1f9   :  { %962 = vsyncadd [#allocation4], 4294967168 }
 0x1fa   :  { %788 = vsyncpa [#allocation3], 1 }
 0x1fb   :  { %789 = vsyncpa [#allocation6], 1 }
 0x1fc   :  { %790 = vsyncpa [#allocation9], 1 }
 0x1fd   :  { %791 = vsyncpa [#allocation4], 1 }

</bundles_post_ra>
